<compile_context>
chip_gen: v6e
topology: v6e:2x2x1
jax: 0.10.0
libtpu: 0.0.40
codegen_flags: <defaults>
</compile_context>

<pallas_src>
import jax
import jax.numpy as jnp
from jax.experimental import pallas as pl
from jax.experimental.pallas import tpu as pltpu


def _layer_scale_kernel(g_ref, x_ref, o_ref):
    # g_ref: (bm, 1) fp32 per-row scale; x_ref/o_ref: (bm, bn) in x.dtype.
    o_ref[...] = (x_ref[...].astype(jnp.float32) * g_ref[...]).astype(o_ref.dtype)


def _round_up(a, b):
    return -(-a // b) * b


def _round_down(a, b):
    return (a // b) * b


def layer_scale(x, gamma, *, target_tile_bytes=4 * 1024 * 1024,
                vmem_limit_bytes=32 * 1024 * 1024, donate_x=False):
    """LayerScale forward: gamma (C,1,1) * x (B,C,H,W), returned in x.dtype.

    Note: matches the PyTorch module exactly for fp32 x.  For bf16 x with fp32
    gamma the multiply is done in fp32 and cast back to x.dtype (autocast-style
    contract, not eager-mode fp32 promotion).

    donate_x=True aliases (a reshape view of) the caller's x buffer into the
    output; the caller must not use x afterwards.
    """
    B, C, H, W = x.shape
    hw = H * W
    rows = B * C
    itemsize = jnp.dtype(x.dtype).itemsize

    # Lane-dense 2D layout (no copies: reshape is a view for XLA).
    x2 = x.reshape(rows, hw)
    # Per-row fp32 scale column: gamma repeated over the batch dim (tiny).
    g2 = jnp.broadcast_to(
        gamma.reshape(1, C, 1).astype(jnp.float32), (B, C, 1)
    ).reshape(rows, 1)

    # ---- dtype-aware tile selection (no padding; ragged blocks allowed) ----
    row_bytes = hw * itemsize
    if row_bytes >= target_tile_bytes:
        # Very wide rows: 8-sublane blocks, tile the lane dim in 128 multiples.
        bm = 8
        bn = max(128, _round_down(target_tile_bytes // (bm * itemsize), 128))
        bn = min(bn, _round_up(hw, 128))
    else:
        # Whole rows per block: each block DMA covers bm contiguous HBM rows.
        # Full-dim lane block is legal even when hw is not a multiple of 128.
        bn = hw
        bm = max(8, _round_down(target_tile_bytes // row_bytes, 8))
        bm = min(bm, _round_up(rows, 8))

    # v7x has 2 TensorCores: keep >= 2 row blocks so both stream from HBM.
    if rows >= 16:
        bm = min(bm, _round_up(-(-rows // 2), 8))

    grid = (pl.cdiv(rows, bm), pl.cdiv(hw, bn))

    cost = pl.CostEstimate(
        flops=rows * hw,
        transcendentals=0,
        bytes_accessed=2 * rows * hw * itemsize + rows * 4,
    )

    out2 = pl.pallas_call(
        _layer_scale_kernel,
        out_shape=jax.ShapeDtypeStruct((rows, hw), x.dtype),
        grid_spec=pltpu.PrefetchScalarGridSpec(
            num_scalar_prefetch=0,
            grid=grid,
            in_specs=[
                # gamma block index is constant across the fastest (lane) grid
                # axis, so Pallas elides its refetch on inner steps.
                pl.BlockSpec((bm, 1), lambda i, j: (i, 0)),
                pl.BlockSpec((bm, bn), lambda i, j: (i, j)),
            ],
            out_specs=pl.BlockSpec((bm, bn), lambda i, j: (i, j)),
        ),
        compiler_params=pltpu.CompilerParams(
            dimension_semantics=("parallel", "parallel"),
            vmem_limit_bytes=vmem_limit_bytes,
        ),
        cost_estimate=cost,
        input_output_aliases=({1: 0} if donate_x else {}),
    )(g2, x2)

    return out2.reshape(B, C, H, W)


if __name__ == "__main__":
    key = jax.random.PRNGKey(0)
    k_x, k_x2, k_x3, k_g = jax.random.split(key, 4)

    # --- Case 1: module-style init (gamma = init_values * ones((C,1,1))) ---
    B, C, H, W = 2, 8, 16, 16
    init_values = 0.1
    gamma = init_values * jnp.ones((C, 1, 1), dtype=jnp.float32)
    x = jax.random.normal(k_x, (B, C, H, W), dtype=jnp.float32)

    out = jax.block_until_ready(layer_scale(x, gamma))
    ref = gamma[None, :, :, :] * x
    assert out.shape == x.shape and out.dtype == x.dtype
    assert jnp.allclose(out, ref, atol=1e-6, rtol=1e-6)

    # --- Case 2: trained-like gamma + spatial size not a multiple of 128 ---
    B2, C2, H2, W2 = 2, 4, 14, 14          # H*W = 196 -> ragged lane block
    gamma2 = jax.random.normal(k_g, (C2, 1, 1), dtype=jnp.float32)
    x2 = jax.random.normal(k_x2, (B2, C2, H2, W2), dtype=jnp.float32)

    out2 = jax.block_until_ready(layer_scale(x2, gamma2))
    ref2 = gamma2[None, :, :, :] * x2
    assert out2.shape == x2.shape
    assert jnp.allclose(out2, ref2, atol=1e-6, rtol=1e-6)

    # --- Case 3: bf16 activations (dtype-aware tile budget path) ---
    B3, C3, H3, W3 = 2, 4, 16, 16
    x3 = jax.random.normal(k_x3, (B3, C3, H3, W3), dtype=jnp.bfloat16)

    out3 = jax.block_until_ready(layer_scale(x3, gamma2))
    ref3 = (gamma2[None, :, :, :] * x3.astype(jnp.float32)).astype(jnp.bfloat16)
    assert out3.shape == x3.shape and out3.dtype == jnp.bfloat16
    assert jnp.allclose(out3.astype(jnp.float32), ref3.astype(jnp.float32),
                        atol=1e-2, rtol=1e-2)

    print("KERNEL_OK")
</pallas_src>

<mosaic_0001>
module attributes {stable_mosaic.version = 11 : i64} {
  func.func @_layer_scale_kernel(%arg0: i32, %arg1: i32, %arg2: memref<8x1xf32, #tpu.memory_space<vmem>>, %arg3: memref<8x256xf32, #tpu.memory_space<vmem>>, %arg4: memref<8x256xf32, #tpu.memory_space<vmem>>) attributes {dimension_semantics = [#tpu.dimension_semantics<parallel>, #tpu.dimension_semantics<parallel>], iteration_bounds = array<i64: 2, 1>, scalar_prefetch = 0 : i64, scratch_operands = 0 : i64, tpu.core_type = #tpu.core_type<tc>, window_params = [{transform_indices = @transform_0, window_bounds = array<i64: 8, 1>}, {transform_indices = @transform_1, window_bounds = array<i64: 8, 256>}, {transform_indices = @transform_2, window_bounds = array<i64: 8, 256>}]} {
    %c0 = arith.constant 0 : index
    %c0_0 = arith.constant 0 : index
    %0 = vector.load %arg3[%c0, %c0_0] : memref<8x256xf32, #tpu.memory_space<vmem>>, vector<8x256xf32>
    %c0_1 = arith.constant 0 : index
    %c0_2 = arith.constant 0 : index
    %1 = vector.load %arg2[%c0_1, %c0_2] : memref<8x1xf32, #tpu.memory_space<vmem>>, vector<8x1xf32>
    %2 = vector.broadcast %1 : vector<8x1xf32> to vector<8x256xf32>
    %3 = arith.mulf %0, %2 : vector<8x256xf32>
    %c0_3 = arith.constant 0 : index
    %c0_4 = arith.constant 0 : index
    %4 = vector.load %arg4[%c0_3, %c0_4] : memref<8x256xf32, #tpu.memory_space<vmem>>, vector<8x256xf32>
    tpu.vector_store %arg4[%c0_3, %c0_4], %3 {strides = array<i32>} : memref<8x256xf32, #tpu.memory_space<vmem>>, vector<8x256xf32>,
    return
  }
  func.func @transform_0(%arg0: i32, %arg1: i32) -> (i32, i32) {
    %c0_i32 = arith.constant 0 : i32
    %c0_i32_0 = arith.constant 0 : i32
    return %arg0, %c0_i32 : i32, i32
  }
  func.func @transform_1(%arg0: i32, %arg1: i32) -> (i32, i32) {
    %c0_i32 = arith.constant 0 : i32
    return %arg0, %arg1 : i32, i32
  }
  func.func @transform_2(%arg0: i32, %arg1: i32) -> (i32, i32) {
    %c0_i32 = arith.constant 0 : i32
    return %arg0, %arg1 : i32, i32
  }
}

</mosaic_0001>

<bundles_post_ra>
// kernel: tpu_custom_call.1
= control target key start
LH: loop header
LB: loop body
LE: loop exit
PB: predicated region body
PF: predicated region fallthrough
CT: control target
= control target key end

     0   :  { %7 = vsyncpa [#allocation3], 0  ;;  %s677_s0 = inlined_call_operand.vmem [shape: f32[16,1], index: 0, kind: input, shape index: {}]   ;;  %s678_s1 = inlined_call_operand.hbm [shape: f32[16,256], index: 1, kind: input, shape index: {}]   ;;  %s679_s2 = inlined_call_operand.hbm [shape: f32[16,256], index: 2, kind: output, shape index: {}]  }
   0x1   :  { %9 = vsyncpa [#allocation3 + $0x1], 0 }
   0x2   :  { %10 = vsyncpa [#allocation4], 0 }
   0x3   :  { %12 = vsyncpa [#allocation4 + $0x1], 0  ;;  %s532_s9 = smov 0   ;;  %s534_s10 = smov 0  }
   0x4   :  { %s536_s11 = smov 0   ;;  %s538_s12 = smov 0  }
   0x5   :  { %s540_s13 = smov 0   ;;  %s542_s14 = smov 0  }
   0x6 LB: > { %s322_s15 = sadd.s32 4294967295, %s512_s14   ;;  %s323_s16 = sadd.s32 4294967294, %s512_s14   ;;  %s512_s14 = sphi %s542_s14, %s18_s14   ;;  %s508_s13 = sphi %s540_s13, %s691_s13   ;;  %s504_s12 = sphi %s538_s12, %s690_s12   ;;  %s500_s11 = sphi %s536_s11, %s689_s11   ;;  %s496_s10 = sphi %s534_s10, %s688_s10   ;;  %s492_s9 = sphi %s532_s9, %s687_s9  }
   0x7   : > { %s30_s17 = sadd.s32 1, %s508_s13  ;;  %s65_s18 = sadd.s32 1, %s500_s11 }
   0x8   : > { %p32_p0 = scmp.ge.s32.totalorder %s30_s17, 2  ;;  %p72_p1 = scmp.ne.s32.totalorder %s500_s11, %s496_s10 }
   0x9   : > { %p73_p2 = scmp.eq.s32.totalorder %s512_s14, 0  ;;  %p78_p3 = scmp.ne.s32.totalorder %s496_s10, %s492_s9 }
   0xa   : > { %s693_s17 = smov (%p32_p0, %s30_s17), 0  ;;  %p79_p5 = scmp.eq.s32.totalorder %s322_s15, 0 }
   0xb   : > { %p573_p4 = por %p73_p2, %p72_p1  ;;  %s60_s20 = ssub.s32 %s508_s13, %s693_s17 }
   0xc   : > { %p104_p6 = scmp.eq.s32.totalorder %s322_s15, 1  ;;  %p63_p7 = scmp.eq.s32.totalorder %s60_s20, 0 }
   0xd   : > { %p579_p8 = por %p79_p5, %p78_p3  ;;  %p110_p10 = scmp.eq.s32.totalorder %s323_s16, 1 }
   0xe   : > { %p583_p9 = por %p104_p6, %p72_p1  ;;  %p352_p13 = scmp.lt.s32.totalorder %s512_s14, 2 }
   0xf   : > { %s588_s23 = scalar_select %p63_p7, %s500_s11, %s65_s18  }
  0x10   : > { %p590_p11 = por %p110_p10, %p78_p3  ;;  %s137_s25 = sand.u32 1, %s500_s11  }
  0x11   : > { %s326_s26 = sshll.u32 %s137_s25, 4  ;;  %s338_s27 = sshll.u32 %s508_s13, 8 }
  0x12   : > { %s683_s24 = scalar_select %p590_p11, 1, 0 }
  0x13   : > { %s149_s30 = scalar_lea.hbm %s678_s1, %s338_s27  ;;  %s141_s3 = scalar_lea.vmem [#allocation2], %s326_s26 }
  0x14   : > { %s151_s4 = sshll.u32 %s141_s3, 4  ;;  %p603_p0 = pnand %p352_p13, %p573_p4  ;;  %s152_s4 = int_to_ptr.vmem [resolvable:$true] %s151_s4 }
  0x15   : > { %p329_p1 = scmp.ge.s32.totalorder %s512_s14, 1  ;;  %p156_p2 = scmp.lt.s32.totalorder %s512_s14, 3 }
  0x16   : > { %s138_s6 = scalar_lea.sflag [#allocation3], %s137_s25  ;;  %p406_p3 = pneg %p603_p0 }
  0x17   : > { %s417_s7 = scalar_lea.vmem %s152_s4, 256  ;;  %s514_s8 = smov [#allocation2]  }
  0x18   : > { %p418_p5 = scmp.ne.s32.totalorder %s152_s4, %s417_s7  ;;  %s422_s15 = sshll.u32 %s514_s8, 4  ;;  %s423_s15 = int_to_ptr.vmem [resolvable:$false] %s422_s15 }
  0x19   : > { %s424_s16 = scalar_lea.vmem %s423_s15, 512  ;;  %p425_p10 = scmp.lt.s32.totalorder %s152_s4, %s423_s15 }
  0x1a   : > { %p420_p6 = pnand %p418_p5, %p406_p3  ;;  %p426_p12 = scmp.lt.s32.totalorder %s424_s16, %s417_s7 }
  0x1c   : > { %p421_p7 = pneg %p420_p6  ;;  %p427_p4 = por %p426_p12, %p425_p10 }
  0x1e   : > { %p428_p13 = pnand %p427_p4, %p421_p7 }
  0x20   : > { %431 = shalt.err (!%p428_p13)
}
  0x21   : > { %347 = dma.hbm_to_vmem [thread:$0]  (!%p603_p0), %s149_s30, 256, %s152_s4, %s138_s6  }
  0x22   : > { %p157_p11 = pnand %p329_p1, %p156_p2 }
  0x23   : > { %s618_s18 = sand.u32 (!%p157_p11), 1, %s496_s10  }
  0x24   : > { %160 = sbr.rel (%p157_p11) target bundleno = 188 (0xbc), region = 28  ;;  %s330_s19 = sshll.u32 (!%p157_p11), %s618_s18, 4 }
  0x25   : > { %s163_s20 = scalar_lea.sflag (!%p157_p11), [#allocation3], %s618_s18  ;;  %s166_s25 = scalar_lea.vmem (!%p157_p11), [#allocation2], %s330_s19 }
  0x29   : > { %483 = dma.done.wait (%p579_p8), %s163_s20, 256  }
  0x2a   : > { %485 = vsyncadd (%p579_p8), %s163_s20, 4294967040  ;;  %p191_p12 = scmp.lt.s32.totalorder %s504_s12, 1  ;;  %v515_v0 = vmov 0   ;;  %v197_v2 = vld [vmem:[%s166_s25] sm:$0xff]  ;;  %v198_v3 = vld [vmem:[%s166_s25 + $0x8] sm:$0xff]  ;;  %s339_s21 = sshll.u32 %s504_s12, 8 }
  0x2b   : > { %403 = vset.pattern.permute.xlu0 %v515_v0  ;;  %s190_s3 = scalar_lea.vmem [#allocation5], %s330_s19  ;;  %s635_s7 = scalar_lea.hbm %s679_s2, %s339_s21 }
  0x2c   : > { %s192_s26 = scalar_select %p191_p12, %s504_s12, 1 }
  0x2d   : > { %s226_s4 = sshll.u32 %s190_s3, 4  ;;  %s210_s8 = scalar_lea.sflag [#allocation4], %s618_s18  ;;  %s227_s4 = int_to_ptr.vmem [resolvable:$true] %s226_s4 }
  0x2e   : > { %s332_s27 = sshll.u32 %s192_s26, 3  ;;  %s432_s15 = scalar_lea.vmem %s227_s4, 256 }
  0x2f   : > { %s194_s30 = scalar_lea.vmem %s677_s0, %s332_s27  ;;  %p433_p8 = scmp.ne.s32.totalorder %s227_s4, %s432_s15 }
  0x30   : > { %v199_v1 = vld [vmem:[%s194_s30] sm:$0xff]  ;;  %s516_s12 = smov [#allocation5]  }
  0x31   : > { %202 = vperm.xlu0 %403, %v199_v1   ;;  %p434_p11 = pnand %p433_p8, %p583_p9  ;;  %s436_s16 = sshll.u32 %s516_s12, 4  ;;  %s437_s16 = int_to_ptr.vmem [resolvable:$false] %s436_s16 }
  0x32   : > { %s438_s19 = scalar_lea.vmem %s437_s16, 512  ;;  %p439_p1 = scmp.lt.s32.totalorder %s227_s4, %s437_s16 }
  0x33   : > { %p435_p0 = pneg %p434_p11  ;;  %p440_p2 = scmp.lt.s32.totalorder %s438_s19, %s432_s15 }
  0x35   : > { %p441_p3 = por %p440_p2, %p439_p1 }
  0x37   : > { %p442_p5 = pnand %p441_p3, %p435_p0 }
  0xac   : > { %v203_v4 = vpop.permute.xlu0 %202 }
  0xad   : > { %v205_v5 = vmul.f32 %v203_v4, %v197_v2  ;;  %v206_v6 = vmul.f32 %v203_v4, %v198_v3 }
  0xaf   : > { %207 = vst [vmem:[%s190_s3] sm:$0xff] %v205_v5  ;;  %208 = vst [vmem:[%s190_s3 + $0x8] sm:$0xff] %v206_v6 }
  0xb0   : > { %445 = shalt.err (!%p442_p5)
}
  0xb1   : > { %s446_s20 = scalar_lea.hbm %s635_s7, 256  ;;  %s450_s26 = scalar_lea.hbm %s679_s2, 512 }
  0xb2   : > { %p447_p6 = scmp.ne.s32.totalorder %s635_s7, %s446_s20  ;;  %p451_p4 = scmp.lt.s32.totalorder %s635_s7, %s679_s2 }
  0xb3   : > { %p452_p13 = scmp.lt.s32.totalorder %s450_s26, %s446_s20 }
  0xb4   : > { %p448_p7 = pnand %p447_p6, %p583_p9 }
  0xb5   : > { %p453_p12 = por %p452_p13, %p451_p4 }
  0xb6   : > { %p449_p10 = pneg %p448_p7 }
  0xb8   : > { %p454_p8 = pnand %p453_p12, %p449_p10 }
  0xba   : > { %457 = shalt.err (!%p454_p8)
}
  0xbb   : > { %342 = dma.vmem_to_hbm [thread:$0]  (%p583_p9), %s227_s4, 256, %s635_s7, %s210_s8  }
  0xbc PF: > { %s238_s29 = sand.u32 1, %s492_s9   ;;  %p685_p11 = scmp.ne.s32.totalorder %s683_s24, 0 }
  0xbd   : > { %p686_p0 = scmp.ge.s32.totalorder %s512_s14, 2  ;;  %s239_s30 = scalar_lea.sflag [#allocation4], %s238_s29 }
  0xbf   : > { %p349_p1 = pnand %p686_p0, %p685_p11 }
  0xc1   : > { %p350_p2 = pneg %p349_p1 }
  0xc3   : > { %487 = dma.done.wait (%p350_p2), %s239_s30, 256  }
  0xc4   : > { %489 = vsyncadd (%p350_p2), %s239_s30, 4294967040  ;;  %s18_s14 = sadd.s32 1, %s512_s14   ;;  %s687_s9 = smov %s496_s10 }
  0xc5   : > { %p15_p3 = scmp.ge.s32.totalorder %s18_s14, 4   ;;  %s688_s10 = smov %s500_s11 }
  0xc6   : > { %s689_s11 = smov %s588_s23  ;;  %s690_s12 = smov %s508_s13 }
  0xc7   : > { %s691_s13 = smov %s693_s17  ;;  %17 = sbr.rel (!%p15_p3) target bundleno = 6 (0x6), region = 76 }
  0xcc   :  { %244 = vsyncpa [#allocation3], 1 }
  0xcd   :  { %246 = vsyncpa [#allocation3 + $0x1], 1 }
  0xce   :  { %247 = vsyncpa [#allocation4], 1 }
  0xcf   :  { %249 = vsyncpa [#allocation4 + $0x1], 1 }

</bundles_post_ra>
